<compile_context>
chip_gen: v7x
topology: tpu7x:2x2x1
jax: 0.10.0
libtpu: 0.0.40
codegen_flags: <defaults>
</compile_context>

<pallas_src>
import functools

import jax
import jax.numpy as jnp
from jax.experimental import pallas as pl
from jax.experimental.pallas import tpu as pltpu

# ----- model dims (Iris_cfg reversed, layer=5): 3 -> 64 -> 128 -> 4 -----
D_IN, D_H1, D_H2, D_OUT = 3, 64, 128, 4
K1_PAD = 8        # layer-1 contraction dim padded 3 -> 8 for the MXU


def _round_up(n, m):
    return ((n + m - 1) // m) * m


def _decoder_kernel(x_ref, w1_ref, b1_ref, w2_ref, b2_ref, w3_ref, b3_ref,
                    o_ref, xpad_ref):
    """One batch tile: x [3, T] -> out [4, T]; batch lives on the lane axis."""
    cdtype = w2_ref.dtype            # bf16 on v6e/v7x, f32 on v5e / exact path

    # --- layer 1 on the MXU --------------------------------------------------
    # Stage the [3, T] tile into an [8, T] zero-padded scratch (tiny VMEM
    # round-trip) so the contraction is a plain (64,8)x(8,T) f32 matmul
    # instead of rank-1 VPU FMAs + broadcast materialization.
    xpad_ref[:D_IN, :] = x_ref[...]
    xpad_ref[D_IN:, :] = jnp.zeros((K1_PAD - D_IN, xpad_ref.shape[1]),
                                   jnp.float32)
    pre1 = jnp.dot(w1_ref[...], xpad_ref[...],
                   preferred_element_type=jnp.float32) + b1_ref[...]  # [64, T]
    h1 = jnp.tanh(pre1.astype(cdtype))        # bf16 tanh on v6e/v7x (EUP)

    # --- layer 2: bf16 operands into the MXU, f32 accumulate ------------------
    pre2 = jnp.dot(w2_ref[...], h1,
                   preferred_element_type=jnp.float32) + b2_ref[...]  # [128, T]
    h2 = jnp.tanh(pre2.astype(cdtype))

    # --- layer 3 (no tanh): 4-row lane-dense f32 store ------------------------
    out = jnp.dot(w3_ref[...], h2,
                  preferred_element_type=jnp.float32) + b3_ref[...]   # [4, T]
    o_ref[...] = out.astype(o_ref.dtype)


def _default_compute_dtype():
    """bf16 intermediate datapath on v6e/v7x (bf16 EUP/VALU/MXU); f32 else."""
    try:
        kind = jax.devices()[0].device_kind.lower()
    except Exception:
        return jnp.float32
    if "v6" in kind or "v7" in kind:
        return jnp.bfloat16
    return jnp.float32


def _prep_params(params, cdtype):
    """PyTorch nn.Linear layout in (W [out,in], b [out]) -> kernel operands."""
    w1, b1, w2, b2, w3, b3 = params
    as_col = lambda b: jnp.asarray(b, jnp.float32).reshape(-1, 1)
    # Layer-1 weight stays f32; K padded 3 -> 8 (zero columns) for the MXU.
    w1p = jnp.zeros((D_H1, K1_PAD), jnp.float32).at[:, :D_IN].set(
        jnp.asarray(w1, jnp.float32))
    w2c = jnp.asarray(w2, cdtype)
    w3c = jnp.asarray(w3, cdtype)
    return w1p, as_col(b1), w2c, as_col(b2), w3c, as_col(b3)


def iris_net_decoder_feature_major(x_fm, params, *, tile_b=8192,
                                   compute_dtype=None):
    """Performance entry point (no relayout passes around the kernel).

    x_fm: [3, B] float32 (feature-major).
    returns: [4, B] float32.
    compute_dtype: None -> bf16 intermediates on v6e/v7x, f32 on v5e/other;
                   pass jnp.float32 to force the exact path everywhere.
    """
    if compute_dtype is None:
        compute_dtype = _default_compute_dtype()
    w1p, b1, w2, b2, w3, b3 = _prep_params(params, compute_dtype)

    x_fm = jnp.asarray(x_fm, jnp.float32)
    B = x_fm.shape[1]

    # Lane tile: 128-aligned, at most tile_b, and capped so the 'parallel'
    # grid has >= 2 steps whenever B allows it (both v7x TensorCores busy).
    tile = min(max(128, _round_up(tile_b, 128)),
               max(128, _round_up(pl.cdiv(B, 2), 128)))
    B_pad = _round_up(B, tile)
    grid = (B_pad // tile,)

    # Only pad when B isn't tile-aligned (aligned B -> zero extra HBM passes).
    x_in = x_fm if B_pad == B else jnp.pad(x_fm, ((0, 0), (0, B_pad - B)))

    const = lambda shape: pl.BlockSpec(shape, lambda i: (0, 0))  # grid-resident

    out = pl.pallas_call(
        _decoder_kernel,
        out_shape=jax.ShapeDtypeStruct((D_OUT, B_pad), jnp.float32),
        grid_spec=pltpu.PrefetchScalarGridSpec(
            num_scalar_prefetch=0,
            grid=grid,
            in_specs=[
                pl.BlockSpec((D_IN, tile), lambda i: (0, i)),  # x tile [3, T]
                const((D_H1, K1_PAD)),                         # W1 [64, 8] f32
                const((D_H1, 1)),                              # b1 [64, 1] f32
                const((D_H2, D_H1)),                           # W2 [128, 64]
                const((D_H2, 1)),                              # b2 [128, 1] f32
                const((D_OUT, D_H2)),                          # W3 [4, 128]
                const((D_OUT, 1)),                             # b3 [4, 1] f32
            ],
            out_specs=pl.BlockSpec((D_OUT, tile), lambda i: (0, i)),
            scratch_shapes=[pltpu.VMEM((K1_PAD, tile), jnp.float32)],
        ),
        compiler_params=pltpu.CompilerParams(
            # batch axis is embarrassingly parallel -> shards across 2 TCs
            dimension_semantics=("parallel",),
        ),
    )(x_in, w1p, b1, w2, b2, w3, b3)

    return out if B_pad == B else out[:, :B]


def iris_net_decoder(x, params, *, tile_b=8192, compute_dtype=None):
    """PyTorch-compatible entry: x [B, 3] float32 -> [B, 4] float32.

    The two transposes here are the only extra XLA passes; performance-
    critical callers should use `iris_net_decoder_feature_major` directly.
    """
    out_fm = iris_net_decoder_feature_major(x.T, params, tile_b=tile_b,
                                            compute_dtype=compute_dtype)
    return out_fm.T


def init_params(key):
    """Deterministic synthetic init matching nn.Linear: W [out, in], b [out]."""
    ks = jax.random.split(key, 6)

    def linear(kw, kb, fan_in, fan_out):
        bound = 1.0 / jnp.sqrt(float(fan_in))
        w = jax.random.uniform(kw, (fan_out, fan_in), jnp.float32, -bound, bound)
        b = jax.random.uniform(kb, (fan_out,), jnp.float32, -bound, bound)
        return w, b

    w1, b1 = linear(ks[0], ks[1], D_IN, D_H1)
    w2, b2 = linear(ks[2], ks[3], D_H1, D_H2)
    w3, b3 = linear(ks[4], ks[5], D_H2, D_OUT)
    return (w1, b1, w2, b2, w3, b3)


def reference(x, params):
    w1, b1, w2, b2, w3, b3 = params
    h1 = jnp.tanh(x @ w1.T + b1)
    h2 = jnp.tanh(h1 @ w2.T + b2)
    return h2 @ w3.T + b3


if __name__ == "__main__":
    key = jax.random.PRNGKey(0)
    k_x, k_p = jax.random.split(key)

    B = 200                                    # small, non-128-aligned batch
    x = jax.random.normal(k_x, (B, D_IN), jnp.float32)
    params = init_params(k_p)
    ref = reference(x, params)

    # 1) Exact f32 path (tight check), PyTorch-compatible [B,3] -> [B,4] entry.
    out_f32 = jax.block_until_ready(
        iris_net_decoder(x, params, compute_dtype=jnp.float32))
    assert out_f32.shape == (B, D_OUT)
    assert jnp.allclose(out_f32, ref, atol=1e-4, rtol=1e-4), float(
        jnp.max(jnp.abs(out_f32 - ref)))

    # 2) Feature-major fast path, exact f32 (no relayout passes).
    out_fm = jax.block_until_ready(
        iris_net_decoder_feature_major(x.T, params, compute_dtype=jnp.float32))
    assert out_fm.shape == (D_OUT, B)
    assert jnp.allclose(out_fm.T, ref, atol=1e-4, rtol=1e-4), float(
        jnp.max(jnp.abs(out_fm.T - ref)))

    # 3) Generation default (bf16 intermediates on v6e/v7x, f32 on v5e):
    #    looser tolerance when the bf16 datapath is active.
    out_def = jax.block_until_ready(iris_net_decoder(x, params))
    assert out_def.shape == (B, D_OUT)
    assert jnp.allclose(out_def, ref, atol=5e-2, rtol=5e-2), float(
        jnp.max(jnp.abs(out_def - ref)))

    print("KERNEL_OK")
</pallas_src>

<mosaic_0001>
module attributes {stable_mosaic.version = 11 : i64} {
  func.func @_decoder_kernel(%arg0: i32, %arg1: memref<3x128xf32, #tpu.memory_space<vmem>>, %arg2: memref<64x8xf32, #tpu.memory_space<vmem>>, %arg3: memref<64x1xf32, #tpu.memory_space<vmem>>, %arg4: memref<128x64xf32, #tpu.memory_space<vmem>>, %arg5: memref<128x1xf32, #tpu.memory_space<vmem>>, %arg6: memref<4x128xf32, #tpu.memory_space<vmem>>, %arg7: memref<4x1xf32, #tpu.memory_space<vmem>>, %arg8: memref<4x128xf32, #tpu.memory_space<vmem>>, %arg9: memref<8x128xf32, #tpu.memory_space<vmem>>) attributes {dimension_semantics = [#tpu.dimension_semantics<parallel>], iteration_bounds = array<i64: 2>, scalar_prefetch = 0 : i64, scratch_operands = 1 : i64, tpu.core_type = #tpu.core_type<tc>, window_params = [{transform_indices = @transform_0, window_bounds = array<i64: 3, 128>}, {pipeline_mode = #tpu.pipeline_mode<synchronous>, transform_indices = @transform_1, window_bounds = array<i64: 64, 8>}, {pipeline_mode = #tpu.pipeline_mode<synchronous>, transform_indices = @transform_2, window_bounds = array<i64: 64, 1>}, {pipeline_mode = #tpu.pipeline_mode<synchronous>, transform_indices = @transform_3, window_bounds = array<i64: 128, 64>}, {pipeline_mode = #tpu.pipeline_mode<synchronous>, transform_indices = @transform_4, window_bounds = array<i64: 128, 1>}, {pipeline_mode = #tpu.pipeline_mode<synchronous>, transform_indices = @transform_5, window_bounds = array<i64: 4, 128>}, {pipeline_mode = #tpu.pipeline_mode<synchronous>, transform_indices = @transform_6, window_bounds = array<i64: 4, 1>}, {transform_indices = @transform_7, window_bounds = array<i64: 4, 128>}]} {
    %c0 = arith.constant 0 : index
    %c0_0 = arith.constant 0 : index
    %0 = vector.load %arg1[%c0, %c0_0] : memref<3x128xf32, #tpu.memory_space<vmem>>, vector<3x128xf32>
    %c0_1 = arith.constant 0 : index
    %c0_2 = arith.constant 0 : index
    %1 = vector.load %arg9[%c0_1, %c0_2] : memref<8x128xf32, #tpu.memory_space<vmem>>, vector<3x128xf32>
    tpu.vector_store %arg9[%c0_1, %c0_2], %0 {strides = array<i32>} : memref<8x128xf32, #tpu.memory_space<vmem>>, vector<3x128xf32>,
    %cst = arith.constant 0.000000e+00 : f32
    %2 = vector.broadcast %cst : f32 to vector<5x128xf32>
    %c3 = arith.constant 3 : index
    %c0_3 = arith.constant 0 : index
    %3 = vector.load %arg9[%c3, %c0_3] : memref<8x128xf32, #tpu.memory_space<vmem>>, vector<5x128xf32>
    tpu.vector_store %arg9[%c3, %c0_3], %2 {strides = array<i32>} : memref<8x128xf32, #tpu.memory_space<vmem>>, vector<5x128xf32>,
    %c0_4 = arith.constant 0 : index
    %c0_5 = arith.constant 0 : index
    %4 = vector.load %arg2[%c0_4, %c0_5] : memref<64x8xf32, #tpu.memory_space<vmem>>, vector<64x8xf32>
    %c0_6 = arith.constant 0 : index
    %c0_7 = arith.constant 0 : index
    %5 = vector.load %arg9[%c0_6, %c0_7] : memref<8x128xf32, #tpu.memory_space<vmem>>, vector<8x128xf32>
    %cst_8 = arith.constant dense<0.000000e+00> : vector<64x128xf32>
    %6 = tpu.matmul %4, %5, %cst_8 {dimension_numbers = #tpu.dot_dimension_numbers<[1], [0], [0], [1], [0, 0, 1, 1], [], []>} : vector<64x8xf32>, vector<8x128xf32>, vector<64x128xf32> -> vector<64x128xf32>
    %c0_9 = arith.constant 0 : index
    %c0_10 = arith.constant 0 : index
    %7 = vector.load %arg3[%c0_9, %c0_10] : memref<64x1xf32, #tpu.memory_space<vmem>>, vector<64x1xf32>
    %8 = vector.broadcast %7 : vector<64x1xf32> to vector<64x128xf32>
    %9 = arith.addf %6, %8 : vector<64x128xf32>
    %10 = math.tanh %9 : vector<64x128xf32>
    %c0_11 = arith.constant 0 : index
    %c0_12 = arith.constant 0 : index
    %11 = vector.load %arg4[%c0_11, %c0_12] : memref<128x64xf32, #tpu.memory_space<vmem>>, vector<128x64xf32>
    %cst_13 = arith.constant dense<0.000000e+00> : vector<128x128xf32>
    %12 = tpu.matmul %11, %10, %cst_13 {dimension_numbers = #tpu.dot_dimension_numbers<[1], [0], [0], [1], [0, 0, 1, 1], [], []>} : vector<128x64xf32>, vector<64x128xf32>, vector<128x128xf32> -> vector<128x128xf32>
    %c0_14 = arith.constant 0 : index
    %c0_15 = arith.constant 0 : index
    %13 = vector.load %arg5[%c0_14, %c0_15] : memref<128x1xf32, #tpu.memory_space<vmem>>, vector<128x1xf32>
    %14 = vector.broadcast %13 : vector<128x1xf32> to vector<128x128xf32>
    %15 = arith.addf %12, %14 : vector<128x128xf32>
    %16 = math.tanh %15 : vector<128x128xf32>
    %c0_16 = arith.constant 0 : index
    %c0_17 = arith.constant 0 : index
    %17 = vector.load %arg6[%c0_16, %c0_17] : memref<4x128xf32, #tpu.memory_space<vmem>>, vector<4x128xf32>
    %cst_18 = arith.constant dense<0.000000e+00> : vector<4x128xf32>
    %18 = tpu.matmul %17, %16, %cst_18 {dimension_numbers = #tpu.dot_dimension_numbers<[1], [0], [0], [1], [0, 0, 1, 1], [], []>} : vector<4x128xf32>, vector<128x128xf32>, vector<4x128xf32> -> vector<4x128xf32>
    %c0_19 = arith.constant 0 : index
    %c0_20 = arith.constant 0 : index
    %19 = vector.load %arg7[%c0_19, %c0_20] : memref<4x1xf32, #tpu.memory_space<vmem>>, vector<4x1xf32>
    %20 = vector.broadcast %19 : vector<4x1xf32> to vector<4x128xf32>
    %21 = arith.addf %18, %20 : vector<4x128xf32>
    %c0_21 = arith.constant 0 : index
    %c0_22 = arith.constant 0 : index
    %22 = vector.load %arg8[%c0_21, %c0_22] : memref<4x128xf32, #tpu.memory_space<vmem>>, vector<4x128xf32>
    tpu.vector_store %arg8[%c0_21, %c0_22], %21 {strides = array<i32>} : memref<4x128xf32, #tpu.memory_space<vmem>>, vector<4x128xf32>,
    return
  }
  func.func @transform_0(%arg0: i32) -> (i32, i32) {
    %c0_i32 = arith.constant 0 : i32
    %c0_i32_0 = arith.constant 0 : i32
    return %c0_i32, %arg0 : i32, i32
  }
  func.func @transform_1(%arg0: i32) -> (i32, i32) {
    %c0_i32 = arith.constant 0 : i32
    %c0_i32_0 = arith.constant 0 : i32
    %c0_i32_1 = arith.constant 0 : i32
    return %c0_i32, %c0_i32_0 : i32, i32
  }
  func.func @transform_2(%arg0: i32) -> (i32, i32) {
    %c0_i32 = arith.constant 0 : i32
    %c0_i32_0 = arith.constant 0 : i32
    %c0_i32_1 = arith.constant 0 : i32
    return %c0_i32, %c0_i32_0 : i32, i32
  }
  func.func @transform_3(%arg0: i32) -> (i32, i32) {
    %c0_i32 = arith.constant 0 : i32
    %c0_i32_0 = arith.constant 0 : i32
    %c0_i32_1 = arith.constant 0 : i32
    return %c0_i32, %c0_i32_0 : i32, i32
  }
  func.func @transform_4(%arg0: i32) -> (i32, i32) {
    %c0_i32 = arith.constant 0 : i32
    %c0_i32_0 = arith.constant 0 : i32
    %c0_i32_1 = arith.constant 0 : i32
    return %c0_i32, %c0_i32_0 : i32, i32
  }
  func.func @transform_5(%arg0: i32) -> (i32, i32) {
    %c0_i32 = arith.constant 0 : i32
    %c0_i32_0 = arith.constant 0 : i32
    %c0_i32_1 = arith.constant 0 : i32
    return %c0_i32, %c0_i32_0 : i32, i32
  }
  func.func @transform_6(%arg0: i32) -> (i32, i32) {
    %c0_i32 = arith.constant 0 : i32
    %c0_i32_0 = arith.constant 0 : i32
    %c0_i32_1 = arith.constant 0 : i32
    return %c0_i32, %c0_i32_0 : i32, i32
  }
  func.func @transform_7(%arg0: i32) -> (i32, i32) {
    %c0_i32 = arith.constant 0 : i32
    %c0_i32_0 = arith.constant 0 : i32
    return %c0_i32, %arg0 : i32, i32
  }
}

</mosaic_0001>

<bundles_post_ra>
// kernel: tpu_custom_call.1
= control target key start
LH: loop header
LB: loop body
LE: loop exit
PB: predicated region body
PF: predicated region fallthrough
CT: control target
= control target key end

     0   :  { %12 = vsyncpa [#allocation4], 0  ;;  %s1644_s0 = inlined_call_operand.vmem [shape: f32[3,256], index: 0, kind: input, shape index: {}]   ;;  %s1645_s1 = inlined_call_operand.vmem [shape: f32[64,8], index: 1, kind: input, shape index: {}]   ;;  %s1646_s2 = inlined_call_operand.vmem [shape: f32[64,1], index: 2, kind: input, shape index: {}]   ;;  %s1647_s3 = inlined_call_operand.vmem [shape: f32[128,64], index: 3, kind: input, shape index: {}]   ;;  %s1648_s4 = inlined_call_operand.vmem [shape: f32[128,1], index: 4, kind: input, shape index: {}]   ;;  %s1649_s5 = inlined_call_operand.vmem [shape: f32[4,128], index: 5, kind: input, shape index: {}]   ;;  %s1650_s6 = inlined_call_operand.vmem [shape: f32[4,1], index: 6, kind: input, shape index: {}]   ;;  %s1651_s7 = inlined_call_operand.hbm [shape: f32[4,256], index: 7, kind: output, shape index: {}]  }
   0x1   :  { %14 = vsyncpa [#allocation4 + $0x1], 0  ;;  %s1360_s24 = smov 0   ;;  %s1362_s25 = smov 0  }
   0x2   :  { %s1364_s26 = smov 0   ;;  %s1366_s27 = smov 0  }
   0x3 LB: > { %s1381_s28 = sadd.s32 4294967295, %s1313_s27   ;;  %s945_s29 = sadd.s32 4294967294, %s1313_s27   ;;  %s1313_s27 = sphi %s1366_s27, %s1657_s27   ;;  %s1309_s26 = sphi %s1364_s26, %s1656_s26   ;;  %s1305_s25 = sphi %s1362_s25, %s1655_s25   ;;  %s1301_s24 = sphi %s1360_s24, %s1654_s24  }
   0x4   : > { %s1385_s30 = sadd.s32 1, %s1313_s27   ;;  %s179_s8 = sadd.s32 1, %s1309_s26 }
   0x5   : > { %s176_s9 = ssub.s32 %s1313_s27, %s1385_s30  ;;  %p189_p0 = scmp.ne.s32.totalorder %s1309_s26, %s1305_s25 }
   0x6   : > { %p177_p1 = scmp.eq.s32.totalorder %s176_s9, 0  ;;  %p190_p2 = scmp.eq.s32.totalorder %s1381_s28, 1 }
   0x7   : > { %p195_p3 = scmp.ne.s32.totalorder %s1305_s25, %s1301_s24  ;;  %p196_p4 = scmp.eq.s32.totalorder %s945_s29, 1 }
   0x8   : > { %s1396_s10 = scalar_select %p177_p1, %s1309_s26, %s179_s8  }
   0x9   : > { %p1398_p5 = por %p190_p2, %p189_p0  ;;  %p1402_p6 = por %p196_p4, %p195_p3 }
   0xa   : > { %p948_p7 = scmp.ge.s32.totalorder %s1313_s27, 1  ;;  %p239_p8 = scmp.lt.s32.totalorder %s1313_s27, 3 }
   0xc   : > { %p240_p9 = pnand %p948_p7, %p239_p8 }
   0xd   : > { %p270_p10 = scmp.lt.s32.totalorder (!%p240_p9), %s1381_s28, 1  ;;  %v277_v0 = vld [vmem:[%s1645_s1] sm:$0xff] (!%p240_p9)  ;;  %vm334_vm0 = vcmask (!%p240_p9), 64512   ;;  %v1315_v1 = vmov (!%p240_p9), 0.0   ;;  %v1316_v2 = vmov (!%p240_p9), 0   ;;  %v288_v4 = vld [vmem:[%s1646_s2 + $0x10] sm:$0xff] (!%p240_p9) }
   0xe   : > { %243 = sbr.rel (%p240_p9) target bundleno = 767 (0x2ff), region = 48  ;;  %276 = vst [vmem:[#allocation2 + $0x3] sm:$0x1f] (!%p240_p9), %v1315_v1  ;;  %1031 = vmatprep.mubr.msk.f32.mxu0 (!%p240_p9), %vm334_vm0, %v277_v0  ;;  %1201 = vset.pattern.permute.xlu0 (!%p240_p9), %v1316_v2  ;;  %v286_v3 = vld [vmem:[%s1646_s2] sm:$0xff] (!%p240_p9)  ;;  %v287_v5 = vld [vmem:[%s1646_s2 + $0x8] sm:$0xff] (!%p240_p9)  ;;  %v289_v6 = vld [vmem:[%s1646_s2 + $0x18] sm:$0xff] (!%p240_p9) }
   0xf   : > { %1202 = vset.pattern.permute.xlu1 (!%p240_p9), %v1316_v2  ;;  %296 = vperm.xlu0 (!%p240_p9), %1201, %v286_v3   ;;  %v290_v8 = vld [vmem:[%s1646_s2 + $0x20] sm:$0xff] (!%p240_p9)  ;;  %v291_v9 = vld [vmem:[%s1646_s2 + $0x28] sm:$0xff] (!%p240_p9)  ;;  %v292_v10 = vld [vmem:[%s1646_s2 + $0x30] sm:$0xff] (!%p240_p9)  ;;  %vm584_vm1 = vcmask (!%p240_p9), 523264   ;;  %vm1318_vm2 = vmmov (!%p240_p9), 0   ;;  %s976_s22 = sshll.u32 (!%p240_p9), %s1381_s28, 6 }
  0x10   : > { %306 = vperm.xlu1 (!%p240_p9), %1202, %v288_v4   ;;  %v293_v11 = vld [vmem:[%s1646_s2 + $0x38] sm:$0xff] (!%p240_p9)  ;;  %v278_v13 = vld [vmem:[%s1645_s1 + $0x8] sm:$0xff] (!%p240_p9)  ;;  %v279_v14 = vld [vmem:[%s1645_s1 + $0x10] sm:$0xff] (!%p240_p9)  ;;  %s1602_s13 = scalar_lea.hbm (!%p240_p9), %s1651_s7, %s976_s22 }
  0x11   : > { %v488_v15 = vld [vmem:[%s1648_s4] sm:$0xff] (!%p240_p9)  ;;  %v489_v16 = vld [vmem:[%s1648_s4 + $0x8] sm:$0xff] (!%p240_p9)  ;;  %v280_v17 = vld [vmem:[%s1645_s1 + $0x18] sm:$0xff] (!%p240_p9) }
  0x12   : > { %v281_v18 = vld [vmem:[%s1645_s1 + $0x20] sm:$0xff] (!%p240_p9)  ;;  %v490_v19 = vld [vmem:[%s1648_s4 + $0x10] sm:$0xff] (!%p240_p9)  ;;  %v491_v20 = vld [vmem:[%s1648_s4 + $0x18] sm:$0xff] (!%p240_p9) }
  0x13   : > { %301 = vperm.xlu0 (!%p240_p9), %1201, %v287_v5   ;;  %v282_v21 = vld [vmem:[%s1645_s1 + $0x28] sm:$0xff] (!%p240_p9)  ;;  %v283_v22 = vld [vmem:[%s1645_s1 + $0x30] sm:$0xff] (!%p240_p9)  ;;  %v492_v23 = vld [vmem:[%s1648_s4 + $0x20] sm:$0xff] (!%p240_p9) }
  0x14   : > { %311 = vperm.xlu1 (!%p240_p9), %1202, %v289_v6   ;;  %v493_v24 = vld [vmem:[%s1648_s4 + $0x28] sm:$0xff] (!%p240_p9)  ;;  %v284_v25 = vld [vmem:[%s1645_s1 + $0x38] sm:$0xff] (!%p240_p9)  ;;  %v494_v26 = vld [vmem:[%s1648_s4 + $0x30] sm:$0xff] (!%p240_p9) }
  0x15   : > { %s271_s15 = scalar_select %p270_p10, %s1381_s28, 1  ;;  %v495_v27 = vld [vmem:[%s1648_s4 + $0x38] sm:$0xff]  ;;  %v496_v28 = vld [vmem:[%s1648_s4 + $0x40] sm:$0xff]  ;;  %v497_v29 = vld [vmem:[%s1648_s4 + $0x48] sm:$0xff] }
  0x16   : > { %v498_v30 = vld [vmem:[%s1648_s4 + $0x50] sm:$0xff]  ;;  %v499_v31 = vld [vmem:[%s1648_s4 + $0x58] sm:$0xff]  ;;  %v500_v32 = vld [vmem:[%s1648_s4 + $0x60] sm:$0xff]  ;;  %s1319_s28 = smov [#allocation3]  }
  0x17   : > { %s950_s20 = sshll.u32 %s271_s15, 2  ;;  %316 = vperm.xlu0 %1201, %v290_v8   ;;  %v501_v33 = vld [vmem:[%s1648_s4 + $0x68] sm:$0xff]  ;;  %v502_v34 = vld [vmem:[%s1648_s4 + $0x70] sm:$0xff]  ;;  %v503_v35 = vld [vmem:[%s1648_s4 + $0x78] sm:$0xff]  ;;  %s1255_s15 = sshll.u32 %s1319_s28, 4  ;;  %s1256_s15 = int_to_ptr.vmem [resolvable:$false] %s1255_s15 }
  0x18   : > { %s273_s8 = scalar_lea.vmem %s1644_s0, %s950_s20  ;;  %321 = vperm.xlu1 %1202, %v291_v9   ;;  %v795_v36 = vld [vmem:[%s1650_s6] sm:$0xf]  ;;  %s267_s20 = sand.u32 1, %s1305_s25  }
  0x19   : > { %v274_v7 = vld [vmem:[%s273_s8] sm:$0x7]  ;;  %s949_s21 = sshll.u32 %s267_s20, 2  ;;  %s873_s14 = scalar_lea.sflag [#allocation4], %s267_s20 }
  0x1a   : > { %275 = vst [vmem:[#allocation2] sm:$0x7] %v274_v7  ;;  %v472_v37 = vld [vmem:[%s1647_s3] sm:$0xff]  ;;  %s269_s23 = scalar_lea.vmem [#allocation3], %s949_s21  ;;  %s1257_s17 = scalar_lea.vmem %s1256_s15, 128 }
  0x1b   : > { %326 = vperm.xlu0 %1201, %v292_v10   ;;  %1059 = vmatprep.mubr.msk.f32.mxu1 %vm584_vm1, %v472_v37  ;;  %s886_s29 = sshll.u32 %s269_s23, 4  ;;  %s1604_s29 = int_to_ptr.vmem [resolvable:$true] %s886_s29 }
  0x1c   : > { %331 = vperm.xlu1 %1202, %v293_v11   ;;  %v473_v11 = vld [vmem:[%s1647_s3 + $0x8] sm:$0xff]  ;;  %s1251_s16 = scalar_lea.vmem %s1604_s29, 64  ;;  %p1258_p0 = scmp.lt.s32.totalorder %s1604_s29, %s1256_s15 }
  0x1d   : > { %p1252_p11 = scmp.ne.s32.totalorder %s1604_s29, %s1251_s16  ;;  %p1259_p1 = scmp.lt.s32.totalorder %s1257_s17, %s1251_s16 }
  0x1f   : > { %506 = vperm.xlu0 %1201, %v488_v15   ;;  %v477_v15 = vld [vmem:[%s1647_s3 + $0x28] sm:$0xff]  ;;  %p1253_p12 = pnand %p1252_p11, %p1398_p5  ;;  %p1260_p2 = por %p1259_p1, %p1258_p0 }
  0x20   : > { %511 = vperm.xlu1 %1202, %v489_v16   ;;  %v478_v16 = vld [vmem:[%s1647_s3 + $0x30] sm:$0xff] }
  0x21   : > { %v285_v12 = vld [vmem:[#allocation2] sm:$0xff]  ;;  %p1254_p13 = pneg %p1253_p12 }
  0x22   : > { %1029 = vmatprep.subr.mxu0 %v285_v12 }
  0x23   : > { %1030 = vmatpush3.msra.mxu0 %v285_v12  ;;  %516 = vperm.xlu0 %1201, %v490_v19   ;;  %v474_v12 = vld [vmem:[%s1647_s3 + $0x10] sm:$0xff]  ;;  %v481_v19 = vld [vmem:[%s1647_s3 + $0x48] sm:$0xff]  ;;  %p1261_p3 = pnand %p1260_p2, %p1254_p13 }
  0x24   : > { %1032 = vmatmul.mubr.msk.f32.vlgmr.msra.gmra.mrb[0].mxu0 %vm334_vm0, %v278_v13  ;;  %521 = vperm.xlu1 %1202, %v491_v20   ;;  %v475_v13 = vld [vmem:[%s1647_s3 + $0x18] sm:$0xff]  ;;  %v482_v20 = vld [vmem:[%s1647_s3 + $0x50] sm:$0xff] }
  0x25   : > { %1034 = vmatprep.mubr.msk.f32.mxu0 %vm334_vm0, %v279_v14  ;;  %v476_v14 = vld [vmem:[%s1647_s3 + $0x20] sm:$0xff] }
  0x27   : > { %526 = vperm.xlu0 %1201, %v492_v23   ;;  %v485_v23 = vld [vmem:[%s1647_s3 + $0x68] sm:$0xff] }
  0x28   : > { %1035 = vmatmul.mubr.msk.f32.gmra.mrb[2].mxu0 %vm334_vm0, %v280_v17  ;;  %531 = vperm.xlu1 %1202, %v493_v24   ;;  %v479_v17 = vld [vmem:[%s1647_s3 + $0x38] sm:$0xff]  ;;  %v486_v24 = vld [vmem:[%s1647_s3 + $0x70] sm:$0xff] }
  0x29   : > { %1037 = vmatprep.mubr.msk.f32.mxu0 %vm334_vm0, %v281_v18  ;;  %v480_v18 = vld [vmem:[%s1647_s3 + $0x40] sm:$0xff] }
  0x2b   : > { %536 = vperm.xlu0 %1201, %v494_v26   ;;  %v1317_v26 = vmov 0.0|0.0  }
  0x2c   : > { %1038 = vmatmul.mubr.msk.f32.gmra.mrb[4].mxu0 %vm334_vm0, %v282_v21  ;;  %541 = vperm.xlu1 %1202, %v495_v27   ;;  %v483_v21 = vld [vmem:[%s1647_s3 + $0x58] sm:$0xff] }
  0x2d   : > { %1040 = vmatprep.mubr.msk.f32.mxu0 %vm334_vm0, %v283_v22  ;;  %v484_v22 = vld [vmem:[%s1647_s3 + $0x60] sm:$0xff]  ;;  %1134 = vmatprep.subr.bf16.mxu0 %v1317_v26 }
  0x2f   : > { %546 = vperm.xlu0 %1201, %v496_v28  }
  0x30   : > { %1041 = vmatmul.mubr.msk.f32.gmra.mrb[6].mxu0 %vm334_vm0, %v284_v25  ;;  %551 = vperm.xlu1 %1202, %v497_v29   ;;  %v487_v25 = vld [vmem:[%s1647_s3 + $0x78] sm:$0xff] }
  0x31   : > { %1115 = vmatprep.mubr.msk.f32.mxu0 %vm1318_vm2, %v1315_v1 }
  0x33   : > { %556 = vperm.xlu0 %1201, %v498_v30  }
  0x34   : > { %561 = vperm.xlu1 %1202, %v499_v31  }
  0x37   : > { %566 = vperm.xlu0 %1201, %v500_v32  }
  0x38   : > { %571 = vperm.xlu1 %1202, %v501_v33  }
  0x3b   : > { %576 = vperm.xlu0 %1201, %v502_v34  }
  0x3c   : > { %581 = vperm.xlu1 %1202, %v503_v35  }
  0x3f   : > { %798 = vperm.xlu0 %1201, %v795_v36  }
  0x8e   : > { %v297_v38 = vpop.permute.xlu0 %296 }
  0x8f   : > { %v307_v39 = vpop.permute.xlu1 %306 }
  0x92   : > { %v302_v40 = vpop.permute.xlu0 %301 }
  0x93   : > { %v312_v41 = vpop.permute.xlu1 %311 }
  0x96   : > { %v317_v51 = vpop.permute.xlu0 %316 }
  0x97   : > { %v322_v49 = vpop.permute.xlu1 %321 }
  0x9a   : > { %v327_v59 = vpop.permute.xlu0 %326 }
  0x9b   : > { %v332_v56 = vpop.permute.xlu1 %331 }
  0x9e   : > { %v507_v28 = vpop.permute.xlu0 %506 }
  0x9f   : > { %v512_v27 = vpop.permute.xlu1 %511 }
  0xa2   : > { %v517_v30 = vpop.permute.xlu0 %516 }
  0xa3   : > { %v522_v29 = vpop.permute.xlu1 %521 }
  0xa6   : > { %v527_v32 = vpop.permute.xlu0 %526 }
  0xa7   : > { %v532_v31 = vpop.permute.xlu1 %531 }
  0xab   : > { %v542_v37 = vpop.permute.xlu1 %541 }
  0xf7   : > { %v1033_v42 = vpop.f32.mrb[0].mxu0 }
  0xf8   : > { %v431_v43 = vadd.f32 %v1033_v42, %v302_v40  ;;  %v425_v44 = vpop.f32.mrb[1].mxu0 }
  0xf9   : > { %v426_v45 = vadd.f32 %v425_v44, %v297_v38 }
  0xfa   : > { %1203 = vtanh.f32 %v431_v43 }
  0xfb   : > { %1205 = vtanh.f32 %v426_v45  ;;  %v1036_v46 = vpop.f32.mrb[2].mxu0  ;;  %v552_v45 = vpop.permute.xlu1 %551 }
  0xfc   : > { %v441_v47 = vadd.f32 %v1036_v46, %v312_v41  ;;  %v435_v48 = vpop.f32.mrb[3].mxu0 }
  0xfd   : > { %v436_v50 = vadd.f32 %v435_v48, %v307_v39  ;;  %v537_v39 = vpop.permute.xlu0 %536 }
  0xfe   : > { %1207 = vtanh.f32 %v441_v47 }
  0xff   : > { %1209 = vtanh.f32 %v436_v50  ;;  %v1039_v52 = vpop.f32.mrb[4].mxu0 }
 0x100   : > { %v451_v53 = vadd.f32 %v1039_v52, %v322_v49  ;;  %v445_v54 = vpop.f32.mrb[5].mxu0 }
 0x101   : > { %v446_v55 = vadd.f32 %v445_v54, %v317_v51  ;;  %v547_v47 = vpop.permute.xlu0 %546 }
 0x102   : > { %1211 = vtanh.f32 %v451_v53 }
 0x103   : > { %1213 = vtanh.f32 %v446_v55  ;;  %v1042_v57 = vpop.f32.mrb[6].mxu0  ;;  %v562_v55 = vpop.permute.xlu1 %561 }
 0x104   : > { %v1204_v58 = vpop.eup %1203  ;;  %v461_v60 = vadd.f32 %v1042_v57, %v332_v56  ;;  %v455_v61 = vpop.f32.mrb[7].mxu0 }
 0x105   : > { %v1206_v62 = vpop.eup %1205  ;;  %v456_v63 = vadd.f32 %v455_v61, %v327_v59 }
 0x106   : > { %1215 = vtanh.f32 %v461_v60  ;;  %v1118_v0 = vpack.c.bf16 %v1204_v58, %v1206_v62  ;;  %v557_v58 = vpop.permute.xlu0 %556 }
 0x107   : > { %1217 = vtanh.f32 %v456_v63 }
 0x108   : > { %v1208_v2 = vpop.eup %1207  ;;  %1119 = vmatprep.subr.bf16.mxu1 %v1118_v0 }
 0x109   : > { %v1210_v3 = vpop.eup %1209  ;;  %1121 = vmatpush3.bf16.msra.mxu1 %v1118_v0 }
 0x10a   : > { %v1122_v4 = vpack.c.bf16 %v1208_v2, %v1210_v3 }
 0x10c   : > { %v1212_v5 = vpop.eup %1211  ;;  %1123 = vmatprep.subr.bf16.mxu1 %v1122_v4 }
 0x10d   : > { %v1214_v6 = vpop.eup %1213  ;;  %1125 = vmatpush3.bf16.msra.mxu1 %v1122_v4 }
 0x10e   : > { %v1126_v7 = vpack.c.bf16 %v1212_v5, %v1214_v6  ;;  %v572_v6 = vpop.permute.xlu1 %571 }
 0x110   : > { %v1216_v8 = vpop.eup %1215  ;;  %1127 = vmatprep.subr.bf16.mxu1 %v1126_v7 }
 0x111   : > { %v1218_v9 = vpop.eup %1217  ;;  %1129 = vmatpush3.bf16.msra.mxu1 %v1126_v7 }
 0x112   : > { %v1130_v10 = vpack.c.bf16 %v1216_v8, %v1218_v9  ;;  %v567_v8 = vpop.permute.xlu0 %566 }
 0x114   : > { %1131 = vmatprep.subr.bf16.mxu1 %v1130_v10 }
 0x115   : > { %1133 = vmatpush3.bf16.msra.mxu1 %v1130_v10 }
 0x118   : > { %1060 = vmatmul.mubr.msk.f32.vlgmr.msra.gmra.mrb[0].mxu1 %vm584_vm1, %v473_v11 }
 0x119   : > { %1062 = vmatprep.mubr.msk.f32.mxu1 %vm584_vm1, %v474_v12 }
 0x11c   : > { %1063 = vmatmul.mubr.msk.f32.gmra.mrb[2].mxu1 %vm584_vm1, %v475_v13 }
 0x11d   : > { %1065 = vmatprep.mubr.msk.f32.mxu1 %vm584_vm1, %v476_v14 }
 0x120   : > { %1066 = vmatmul.mubr.msk.f32.gmra.mrb[4].mxu1 %vm584_vm1, %v477_v15 }
 0x121   : > { %1068 = vmatprep.mubr.msk.f32.mxu1 %vm584_vm1, %v478_v16 }
 0x124   : > { %1069 = vmatmul.mubr.msk.f32.gmra.mrb[6].mxu1 %vm584_vm1, %v479_v17  ;;  %v582_v17 = vpop.permute.xlu1 %581 }
 0x125   : > { %1071 = vmatprep.mubr.msk.f32.mxu1 %vm584_vm1, %v480_v18 }
 0x128   : > { %1072 = vmatmul.mubr.msk.f32.gmra.mrb[8].mxu1 %vm584_vm1, %v481_v19 }
 0x129   : > { %1074 = vmatprep.mubr.msk.f32.mxu1 %vm584_vm1, %v482_v20  ;;  %v577_v20 = vpop.permute.xlu0 %576 }
 0x12c   : > { %1075 = vmatmul.mubr.msk.f32.gmra.mrb[10].mxu1 %vm584_vm1, %v483_v21 }
 0x12d   : > { %1077 = vmatprep.mubr.msk.f32.mxu1 %vm584_vm1, %v484_v22 }
 0x130   : > { %1078 = vmatmul.mubr.msk.f32.gmra.mrb[12].mxu1 %vm584_vm1, %v485_v23 }
 0x131   : > { %1080 = vmatprep.mubr.msk.f32.mxu1 %vm584_vm1, %v486_v24 }
 0x134   : > { %1081 = vmatmul.mubr.msk.f32.gmra.mrb[14].mxu1 %vm584_vm1, %v487_v25 }
 0x1eb   : > { %v1061_v33 = vpop.f32.mrb[0].mxu1 }
 0x1ec   : > { %v705_v34 = vadd.f32 %v1061_v33, %v512_v27  ;;  %v699_v35 = vpop.f32.mrb[1].mxu1 }
 0x1ed   : > { %v700_v36 = vadd.f32 %v699_v35, %v507_v28 }
 0x1ee   : > { %1219 = vtanh.f32 %v705_v34 }
 0x1ef   : > { %1221 = vtanh.f32 %v700_v36  ;;  %v1064_v38 = vpop.f32.mrb[2].mxu1  ;;  %v794_v36 = vld [vmem:[%s1649_s5] sm:$0xf] }
 0x1f0   : > { %v715_v40 = vadd.f32 %v1064_v38, %v522_v29  ;;  %v709_v41 = vpop.f32.mrb[3].mxu1 }
 0x1f1   : > { %v710_v42 = vadd.f32 %v709_v41, %v517_v30 }
 0x1f2   : > { %1223 = vtanh.f32 %v715_v40 }
 0x1f3   : > { %1225 = vtanh.f32 %v710_v42  ;;  %v1067_v1 = vpop.f32.mrb[4].mxu1 }
 0x1f4   : > { %v725_v43 = vadd.f32 %v1067_v1, %v532_v31  ;;  %v719_v44 = vpop.f32.mrb[5].mxu1 }
 0x1f5   : > { %v720_v46 = vadd.f32 %v719_v44, %v527_v32 }
 0x1f6   : > { %1227 = vtanh.f32 %v725_v43 }
 0x1f7   : > { %1229 = vtanh.f32 %v720_v46  ;;  %v1070_v48 = vpop.f32.mrb[6].mxu1 }
 0x1f8   : > { %v1220_v49 = vpop.eup %1219  ;;  %v735_v50 = vadd.f32 %v1070_v48, %v542_v37  ;;  %v729_v51 = vpop.f32.mrb[7].mxu1 }
 0x1f9   : > { %v1222_v52 = vpop.eup %1221  ;;  %v730_v53 = vadd.f32 %v729_v51, %v537_v39  ;;  %v799_v37 = vpop.permute.xlu0 %798 }
 0x1fa   : > { %1231 = vtanh.f32 %v735_v50  ;;  %v1135_v54 = vpack.c.bf16 %v1220_v49, %v1222_v52 }
 0x1fb   : > { %1233 = vtanh.f32 %v730_v53  ;;  %v1073_v56 = vpop.f32.mrb[8].mxu1 }
 0x1fc   : > { %v1224_v57 = vpop.eup %1223  ;;  %v745_v59 = vadd.f32 %v1073_v56, %v552_v45  ;;  %v739_v60 = vpop.f32.mrb[9].mxu1  ;;  %1136 = vmatpush3.bf16.msra.mxu0 %v1135_v54 }
 0x1fd   : > { %v1226_v61 = vpop.eup %1225  ;;  %v740_v62 = vadd.f32 %v739_v60, %v547_v47  ;;  %1137 = vmatprep.subr.bf16.mxu0 %v1317_v26 }
 0x1fe   : > { %1235 = vtanh.f32 %v745_v59  ;;  %v1138_v63 = vpack.c.bf16 %v1224_v57, %v1226_v61 }
 0x1ff   : > { %1237 = vtanh.f32 %v740_v62  ;;  %v1076_v0 = vpop.f32.mrb[10].mxu1 }
 0x200   : > { %v1228_v2 = vpop.eup %1227  ;;  %v755_v3 = vadd.f32 %v1076_v0, %v562_v55  ;;  %v749_v4 = vpop.f32.mrb[11].mxu1  ;;  %1139 = vmatpush3.bf16.msra.mxu0 %v1138_v63 }
 0x201   : > { %v1230_v5 = vpop.eup %1229  ;;  %v750_v7 = vadd.f32 %v749_v4, %v557_v58  ;;  %1140 = vmatprep.subr.bf16.mxu0 %v1317_v26 }
 0x202   : > { %1239 = vtanh.f32 %v755_v3  ;;  %v1141_v9 = vpack.c.bf16 %v1228_v2, %v1230_v5 }
 0x203   : > { %1241 = vtanh.f32 %v750_v7  ;;  %v1079_v10 = vpop.f32.mrb[12].mxu1 }
 0x204   : > { %v1232_v11 = vpop.eup %1231  ;;  %v765_v12 = vadd.f32 %v1079_v10, %v572_v6  ;;  %v759_v13 = vpop.f32.mrb[13].mxu1  ;;  %1142 = vmatpush3.bf16.msra.mxu0 %v1141_v9 }
 0x205   : > { %v1234_v14 = vpop.eup %1233  ;;  %v760_v15 = vadd.f32 %v759_v13, %v567_v8  ;;  %1143 = vmatprep.subr.bf16.mxu0 %v1317_v26 }
 0x206   : > { %1243 = vtanh.f32 %v765_v12  ;;  %v1144_v16 = vpack.c.bf16 %v1232_v11, %v1234_v14 }
 0x207   : > { %1245 = vtanh.f32 %v760_v15  ;;  %v1082_v18 = vpop.f32.mrb[14].mxu1 }
 0x208   : > { %v1236_v19 = vpop.eup %1235  ;;  %v775_v21 = vadd.f32 %v1082_v18, %v582_v17  ;;  %v769_v22 = vpop.f32.mrb[15].mxu1  ;;  %1145 = vmatpush3.bf16.msra.mxu0 %v1144_v16 }
 0x209   : > { %v1238_v23 = vpop.eup %1237  ;;  %v770_v24 = vadd.f32 %v769_v22, %v577_v20  ;;  %1146 = vmatprep.subr.bf16.mxu0 %v1317_v26 }
 0x20a   : > { %1247 = vtanh.f32 %v775_v21  ;;  %v1147_v25 = vpack.c.bf16 %v1236_v19, %v1238_v23 }
 0x20b   : > { %1249 = vtanh.f32 %v770_v24 }
 0x20c   : > { %v1240_v27 = vpop.eup %1239  ;;  %1148 = vmatpush3.bf16.msra.mxu0 %v1147_v25 }
 0x20d   : > { %v1242_v28 = vpop.eup %1241  ;;  %1149 = vmatprep.subr.bf16.mxu0 %v1317_v26 }
 0x20e   : > { %v1150_v29 = vpack.c.bf16 %v1240_v27, %v1242_v28 }
 0x210   : > { %v1244_v30 = vpop.eup %1243  ;;  %1151 = vmatpush3.bf16.msra.mxu0 %v1150_v29 }
 0x211   : > { %v1246_v31 = vpop.eup %1245  ;;  %1152 = vmatprep.subr.bf16.mxu0 %v1317_v26 }
 0x212   : > { %v1153_v32 = vpack.c.bf16 %v1244_v30, %v1246_v31 }
 0x214   : > { %v1248_v33 = vpop.eup %1247  ;;  %1154 = vmatpush3.bf16.msra.mxu0 %v1153_v32 }
 0x215   : > { %v1250_v34 = vpop.eup %1249  ;;  %1155 = vmatprep.subr.bf16.mxu0 %v1317_v26 }
 0x216   : > { %v1156_v35 = vpack.c.bf16 %v1248_v33, %v1250_v34 }
 0x218   : > { %1157 = vmatpush3.bf16.msra.mxu0 %v1156_v35 }
 0x21b   : > { %1116 = vmatmul.mubr.f32.vlgmr.msra.gmra.mrb[8].mxu0 %v794_v36 }
 0x2ee   : > { %v867_v38 = vpop.f32.mrb[8].mxu0 }
 0x2ef   : > { %v868_v39 = vadd.f32 %v867_v38, %v799_v37  ;;  %v1117_v40 = vpop.f32.mrb[9].mxu0 }
 0x2f1   : > { %871 = vst [vmem:[%s269_s23] sm:$0xf] %v868_v39 }
 0x2f2   : > { %1264 = shalt.err (!%p1261_p3)
}
 0x2f3   : > { %s1265_s18 = scalar_lea.hbm %s1602_s13, 64  ;;  %s1269_s21 = scalar_lea.hbm %s1651_s7, 128 }
 0x2f4   : > { %p1266_p4 = scmp.ne.s32.totalorder %s1602_s13, %s1265_s18  ;;  %p1270_p9 = scmp.lt.u32.totalorder %s1602_s13, %s1651_s7 }
 0x2f5   : > { %p1271_p10 = scmp.lt.u32.totalorder %s1269_s21, %s1265_s18  ;;  %p1273_p12 = scmp.lt.u32.totalorder %s1265_s18, %s1602_s13 }
 0x2f6   : > { %p1267_p7 = pnand %p1266_p4, %p1398_p5 }
 0x2f7   : > { %p1272_p11 = por %p1271_p10, %p1270_p9 }
 0x2f8   : > { %p1268_p8 = pneg %p1267_p7 }
 0x2f9   : > { %p1274_p13 = por %p1273_p12, %p1272_p11 }
 0x2fb   : > { %p1275_p0 = pnand %p1274_p13, %p1268_p8 }
 0x2fd   : > { %1278 = shalt.err (!%p1275_p0)
}
 0x2fe   : > { %1158 = dma.vmem_to_hbm [thread:$0]  (%p1398_p5), %s1604_s29, 64, %s1602_s13, %s873_s14  }
 0x2ff PF: > { %p1164_p1 = scmp.ge.s32.totalorder %s1313_s27, 2  ;;  %s898_s8 = sand.u32 1, %s1301_s24  }
 0x300   : > { %s899_s9 = scalar_lea.sflag [#allocation4], %s898_s8 }
 0x301   : > { %p1161_p2 = pnand %p1164_p1, %p1402_p6 }
 0x303   : > { %1296 = dma.done.wait (!%p1161_p2), %s899_s9, 64  }
 0x304   : > { %1298 = vsyncadd (!%p1161_p2), %s899_s9, 4294967232  ;;  %p17_p3 = scmp.ge.s32.totalorder %s1385_s30, 4   ;;  %s1654_s24 = smov %s1305_s25 }
 0x305   : > { %s1655_s25 = smov %s1309_s26  ;;  %s1656_s26 = smov %s1396_s10 }
 0x306   : > { %s1657_s27 = smov %s1385_s30  ;;  %19 = sbr.rel (!%p17_p3) target bundleno = 3 (0x3), region = 83 }
 0x30d   :  { %904 = vsyncpa [#allocation4], 1 }
 0x30e   :  { %906 = vsyncpa [#allocation4 + $0x1], 1 }

</bundles_post_ra>
